<compile_context>
chip_gen: v5e
topology: v5e:2x2
jax: 0.10.0
libtpu: 0.0.40
codegen_flags: <defaults>
</compile_context>

<pallas_src>
import jax
import jax.numpy as jnp
from jax import lax
from jax.experimental import pallas as pl
from jax.experimental.pallas import tpu as pltpu


def _batch_ce_kernel(x_ref, t_ref, o_ref, m_ref, l_ref, xt_ref):
    """x_ref: (TN, TC) logits tile, t_ref: (TN, 1) int32, o_ref: (TN, 1) f32 loss.

    Scratch (persists across the class-tile axis):
      m_ref : (TN, 1) f32 running max
      l_ref : (TN, 1) f32 running sum of exp(x - m)
      xt_ref: (TN, 1) f32 accumulated target logit
    """
    ci = pl.program_id(1)

    @pl.when(ci == 0)
    def _init():
        m_ref[...] = jnp.full(m_ref.shape, -jnp.inf, dtype=m_ref.dtype)
        l_ref[...] = jnp.zeros(l_ref.shape, dtype=l_ref.dtype)
        xt_ref[...] = jnp.zeros(xt_ref.shape, dtype=xt_ref.dtype)

    x = x_ref[...]                      # native dtype (bf16 stays bf16 on VPU)
    tile_c = x.shape[1]

    # Local (per-tile) target index: offset applied to the (TN,1) target, not a
    # (TN,TC) global iota -> saves one full-tile int add per class step.
    t_local = t_ref[...] - ci * tile_c                        # (TN, 1) int32
    lane_idx = lax.broadcasted_iota(jnp.int32, x.shape, 1)    # (TN, TC)

    # Gather the target logit: compare/select in the input dtype; the row sum is
    # exact (at most one non-zero lane per row), so cast only the (TN,1) result.
    hit = jnp.where(lane_idx == t_local, x, 0)
    xt_ref[...] += jnp.sum(hit, axis=1, keepdims=True).astype(jnp.float32)

    # Online logsumexp over the class axis: max in the input dtype (exact),
    # exp / accumulation in f32 for accuracy.
    tile_max = jnp.max(x, axis=1, keepdims=True).astype(jnp.float32)
    m_prev = m_ref[...]
    m_new = jnp.maximum(m_prev, tile_max)
    p = jnp.exp(x.astype(jnp.float32) - m_new)
    l_ref[...] = l_ref[...] * jnp.exp(m_prev - m_new) + jnp.sum(
        p, axis=1, keepdims=True
    )
    m_ref[...] = m_new

    @pl.when(ci == pl.num_programs(1) - 1)
    def _finalize():
        # loss = logsumexp(x) - x[target] == -log_softmax(x)[target]
        o_ref[...] = (m_ref[...] + jnp.log(l_ref[...]) - xt_ref[...]).astype(o_ref.dtype)


def _vmem_capacity_bytes() -> int:
    """Physical VMEM capacity for this chip; conservative fallback if unknown."""
    try:
        info = pltpu.get_tpu_info()
        cap = getattr(info, "vmem_capacity_bytes", None)
        if cap:
            return int(cap)
    except Exception:
        pass
    return 64 << 20  # conservative (v7x physical VMEM)


def _sublane_multiple(itemsize: int) -> int:
    return {4: 8, 2: 16, 1: 32}.get(itemsize, 8)


def _choose_tiles(n: int, c: int, itemsize: int, vmem_cap: int):
    """Pick (tile_n, tile_c) sized against the chip's VMEM double-buffer budget."""
    # Class tile: keep the whole class axis unless it is huge; otherwise search
    # any 128-aligned divisor of C (block last dim must be a multiple of 128 or
    # equal C). Never pad C (that would cost a full HBM copy).
    tile_c = c
    if c > 8192:
        cand = 8192
        while cand >= 128:
            if c % cand == 0:
                tile_c = cand
                break
            cand -= 128

    sub = _sublane_multiple(itemsize)

    # Per-buffer logits budget: 16 MiB where VMEM is plentiful (v5e/v6e: 128 MiB),
    # 8 MiB on v7x (64 MiB physical).
    per_buf = (16 << 20) if vmem_cap >= (96 << 20) else (8 << 20)
    tile_n = per_buf // max(1, tile_c * itemsize)
    tile_n = max(sub, min(1024, (tile_n // sub) * sub))

    # Never tile past the (sublane-aligned) batch.
    n_ceil = ((n + sub - 1) // sub) * sub
    tile_n = min(tile_n, n_ceil)

    # Ensure >= 2 row tiles when splittable so the parallel row axis can shard
    # across both TensorCores on v7x (one extra grid step is ~free on 1-TC chips).
    if tile_n >= n_ceil and n_ceil >= 2 * sub:
        half = -(-n // 2)
        tile_n = ((half + sub - 1) // sub) * sub

    return tile_n, tile_c


def _vmem_footprint(tile_n: int, tile_c: int, itemsize: int) -> int:
    lane = 128  # (TN,1) blocks/scratch pad to 128 lanes in VMEM
    b = 2 * tile_n * tile_c * itemsize   # logits double buffer
    b += 2 * tile_n * lane * 4           # target (int32) double buffer, lane-padded
    b += 2 * tile_n * lane * 4           # output (f32) double buffer, lane-padded
    b += 3 * tile_n * lane * 4           # m/l/x_t scratch, lane-padded
    return b


def batch_cross_entropy(x: jax.Array, target: jax.Array, *, tile_n=None, tile_c=None) -> jax.Array:
    """Per-sample cross entropy: x (N, C) float logits, target (N,) int labels -> (N, 1) f32."""
    N, C = x.shape
    itemsize = jnp.dtype(x.dtype).itemsize
    sub = _sublane_multiple(itemsize)
    vmem_cap = _vmem_capacity_bytes()

    auto_n, auto_c = _choose_tiles(N, C, itemsize, vmem_cap)
    if tile_n is None:
        tile_n = auto_n
    if tile_c is None:
        tile_c = auto_c
    if C % tile_c != 0:
        raise ValueError(f"tile_c={tile_c} must divide C={C}")
    tile_n = max(sub, (tile_n // sub) * sub)

    # Guard manual overrides: shrink tile_n until the double-buffered footprint
    # fits within physical VMEM (with headroom). Auto tiles already fit.
    budget = vmem_cap - (8 << 20)
    while tile_n > sub and _vmem_footprint(tile_n, tile_c, itemsize) > budget:
        tile_n = max(sub, ((tile_n // 2) // sub) * sub)

    tgt = target.astype(jnp.int32).reshape(N, 1)

    # No padding of the logits: grid over cdiv(N, tile_n); trailing partial row
    # blocks are handled by Pallas masked boundary blocks (rows are independent,
    # out-of-bounds output rows are never written).
    grid = (pl.cdiv(N, tile_n), C // tile_c)

    vmem_limit = _vmem_footprint(tile_n, tile_c, itemsize) + (8 << 20)
    vmem_limit = int(min(vmem_cap, max(32 << 20, vmem_limit)))

    out = pl.pallas_call(
        _batch_ce_kernel,
        out_shape=jax.ShapeDtypeStruct((N, 1), jnp.float32),
        grid_spec=pltpu.PrefetchScalarGridSpec(
            num_scalar_prefetch=0,
            grid=grid,
            in_specs=[
                pl.BlockSpec((tile_n, tile_c), lambda i, j: (i, j)),
                pl.BlockSpec((tile_n, 1), lambda i, j: (i, 0)),
            ],
            out_specs=pl.BlockSpec((tile_n, 1), lambda i, j: (i, 0)),
            scratch_shapes=[
                pltpu.VMEM((tile_n, 1), jnp.float32),   # m (running max)
                pltpu.VMEM((tile_n, 1), jnp.float32),   # l (running sum-exp)
                pltpu.VMEM((tile_n, 1), jnp.float32),   # x_t (target logit)
            ],
        ),
        compiler_params=pltpu.CompilerParams(
            dimension_semantics=("parallel", "arbitrary"),
            vmem_limit_bytes=vmem_limit,
        ),
    )(x, tgt)
    return out


if __name__ == "__main__":
    key = jax.random.PRNGKey(0)
    kx, kt, kx2, kt2 = jax.random.split(key, 4)

    def ref_loss(x, t):
        logp = jax.nn.log_softmax(x.astype(jnp.float32), axis=1)
        return -jnp.take_along_axis(logp, t.reshape(-1, 1), axis=1)

    # Case 1: small, tile-divisible batch.
    N, C = 16, 32
    x = jax.random.normal(kx, (N, C), dtype=jnp.float32)
    target = jax.random.randint(kt, (N,), 0, C, dtype=jnp.int32)
    out = batch_cross_entropy(x, target)
    jax.block_until_ready(out)
    assert out.shape == (N, 1)
    assert jnp.allclose(out, ref_loss(x, target), atol=1e-5, rtol=1e-5), "mismatch (case 1)"

    # Case 2: ragged batch (N % tile_n != 0) exercising masked boundary blocks.
    N2, C2 = 13, 40
    x2 = jax.random.normal(kx2, (N2, C2), dtype=jnp.float32)
    target2 = jax.random.randint(kt2, (N2,), 0, C2, dtype=jnp.int32)
    out2 = batch_cross_entropy(x2, target2, tile_n=8)
    jax.block_until_ready(out2)
    assert out2.shape == (N2, 1)
    assert jnp.allclose(out2, ref_loss(x2, target2), atol=1e-5, rtol=1e-5), "mismatch (case 2)"

    print("KERNEL_OK")
</pallas_src>

<mosaic_0001>
module attributes {stable_mosaic.version = 11 : i64} {
  func.func @_batch_ce_kernel(%arg0: i32, %arg1: i32, %arg2: memref<8x32xf32, #tpu.memory_space<vmem>>, %arg3: memref<8x1xi32, #tpu.memory_space<vmem>>, %arg4: memref<8x1xf32, #tpu.memory_space<vmem>>, %arg5: memref<8x1xf32, #tpu.memory_space<vmem>>, %arg6: memref<8x1xf32, #tpu.memory_space<vmem>>, %arg7: memref<8x1xf32, #tpu.memory_space<vmem>>) attributes {dimension_semantics = [#tpu.dimension_semantics<parallel>, #tpu.dimension_semantics<arbitrary>], iteration_bounds = array<i64: 2, 1>, scalar_prefetch = 0 : i64, scratch_operands = 3 : i64, tpu.core_type = #tpu.core_type<tc>, window_params = [{transform_indices = @transform_0, window_bounds = array<i64: 8, 32>}, {transform_indices = @transform_1, window_bounds = array<i64: 8, 1>}, {transform_indices = @transform_2, window_bounds = array<i64: 8, 1>}]} {
    %c0_i32 = arith.constant 0 : i32
    %0 = arith.cmpi eq, %arg1, %c0_i32 : i32
    %1 = arith.extui %0 : i1 to i32
    %c0_i32_0 = arith.constant 0 : i32
    %2 = arith.cmpi ne, %1, %c0_i32_0 : i32
    scf.if %2 {
      %cst_21 = arith.constant 0xFF800000 : f32
      %38 = vector.broadcast %cst_21 : f32 to vector<8x1xf32>
      %c0_22 = arith.constant 0 : index
      %c0_23 = arith.constant 0 : index
      %39 = vector.load %arg5[%c0_22, %c0_23] : memref<8x1xf32, #tpu.memory_space<vmem>>, vector<8x1xf32>
      tpu.vector_store %arg5[%c0_22, %c0_23], %38 {strides = array<i32>} : memref<8x1xf32, #tpu.memory_space<vmem>>, vector<8x1xf32>,
      %cst_24 = arith.constant 0.000000e+00 : f32
      %40 = vector.broadcast %cst_24 : f32 to vector<8x1xf32>
      %c0_25 = arith.constant 0 : index
      %c0_26 = arith.constant 0 : index
      %41 = vector.load %arg6[%c0_25, %c0_26] : memref<8x1xf32, #tpu.memory_space<vmem>>, vector<8x1xf32>
      tpu.vector_store %arg6[%c0_25, %c0_26], %40 {strides = array<i32>} : memref<8x1xf32, #tpu.memory_space<vmem>>, vector<8x1xf32>,
      %cst_27 = arith.constant 0.000000e+00 : f32
      %42 = vector.broadcast %cst_27 : f32 to vector<8x1xf32>
      %c0_28 = arith.constant 0 : index
      %c0_29 = arith.constant 0 : index
      %43 = vector.load %arg7[%c0_28, %c0_29] : memref<8x1xf32, #tpu.memory_space<vmem>>, vector<8x1xf32>
      tpu.vector_store %arg7[%c0_28, %c0_29], %42 {strides = array<i32>} : memref<8x1xf32, #tpu.memory_space<vmem>>, vector<8x1xf32>,
    } else {
    }
    %c0 = arith.constant 0 : index
    %c0_1 = arith.constant 0 : index
    %3 = vector.load %arg2[%c0, %c0_1] : memref<8x32xf32, #tpu.memory_space<vmem>>, vector<8x32xf32>
    %c0_2 = arith.constant 0 : index
    %c0_3 = arith.constant 0 : index
    %4 = vector.load %arg3[%c0_2, %c0_3] : memref<8x1xi32, #tpu.memory_space<vmem>>, vector<8x1xi32>
    %c32_i32 = arith.constant 32 : i32
    %5 = arith.muli %arg1, %c32_i32 : i32
    %6 = vector.broadcast %5 : i32 to vector<8x1xi32>
    %7 = arith.subi %4, %6 : vector<8x1xi32>
    %8 = tpu.iota {dimensions = array<i32: 1>} : vector<8x32xi32>
    %9 = vector.broadcast %7 : vector<8x1xi32> to vector<8x32xi32>
    %10 = arith.cmpi eq, %8, %9 : vector<8x32xi32>
    %c0_i32_4 = arith.constant 0 : i32
    %11 = arith.sitofp %c0_i32_4 : i32 to f32
    %12 = vector.broadcast %11 : f32 to vector<8x32xf32>
    %13 = arith.select %10, %3, %12 : vector<8x32xi1>, vector<8x32xf32>
    %c0_5 = arith.constant 0 : index
    %c0_6 = arith.constant 0 : index
    %14 = vector.load %arg7[%c0_5, %c0_6] : memref<8x1xf32, #tpu.memory_space<vmem>>, vector<8x1xf32>
    %cst = arith.constant dense<0.000000e+00> : vector<8xf32>
    %15 = vector.multi_reduction <add>, %13, %cst [1] : vector<8x32xf32> to vector<8xf32>
    %16 = vector.shape_cast %15 : vector<8xf32> to vector<8x1xf32>
    %17 = arith.addf %14, %16 : vector<8x1xf32>
    %c0_7 = arith.constant 0 : index
    %c0_8 = arith.constant 0 : index
    %18 = vector.load %arg7[%c0_7, %c0_8] : memref<8x1xf32, #tpu.memory_space<vmem>>, vector<8x1xf32>
    tpu.vector_store %arg7[%c0_7, %c0_8], %17 {strides = array<i32>} : memref<8x1xf32, #tpu.memory_space<vmem>>, vector<8x1xf32>,
    %cst_9 = arith.constant dense<0xFF800000> : vector<8xf32>
    %19 = vector.multi_reduction <maximumf>, %3, %cst_9 [1] : vector<8x32xf32> to vector<8xf32>
    %20 = vector.shape_cast %19 : vector<8xf32> to vector<8x1xf32>
    %c0_10 = arith.constant 0 : index
    %c0_11 = arith.constant 0 : index
    %21 = vector.load %arg5[%c0_10, %c0_11] : memref<8x1xf32, #tpu.memory_space<vmem>>, vector<8x1xf32>
    %22 = arith.maximumf %21, %20 : vector<8x1xf32>
    %23 = vector.broadcast %22 : vector<8x1xf32> to vector<8x32xf32>
    %24 = arith.subf %3, %23 : vector<8x32xf32>
    %25 = math.exp %24 : vector<8x32xf32>
    %c0_12 = arith.constant 0 : index
    %c0_13 = arith.constant 0 : index
    %26 = vector.load %arg6[%c0_12, %c0_13] : memref<8x1xf32, #tpu.memory_space<vmem>>, vector<8x1xf32>
    %27 = arith.subf %21, %22 : vector<8x1xf32>
    %28 = math.exp %27 : vector<8x1xf32>
    %29 = arith.mulf %26, %28 : vector<8x1xf32>
    %cst_14 = arith.constant dense<0.000000e+00> : vector<8xf32>
    %30 = vector.multi_reduction <add>, %25, %cst_14 [1] : vector<8x32xf32> to vector<8xf32>
    %31 = vector.shape_cast %30 : vector<8xf32> to vector<8x1xf32>
    %32 = arith.addf %29, %31 : vector<8x1xf32>
    %c0_15 = arith.constant 0 : index
    %c0_16 = arith.constant 0 : index
    %33 = vector.load %arg6[%c0_15, %c0_16] : memref<8x1xf32, #tpu.memory_space<vmem>>, vector<8x1xf32>
    tpu.vector_store %arg6[%c0_15, %c0_16], %32 {strides = array<i32>} : memref<8x1xf32, #tpu.memory_space<vmem>>, vector<8x1xf32>,
    %c0_17 = arith.constant 0 : index
    %c0_18 = arith.constant 0 : index
    %34 = vector.load %arg5[%c0_17, %c0_18] : memref<8x1xf32, #tpu.memory_space<vmem>>, vector<8x1xf32>
    tpu.vector_store %arg5[%c0_17, %c0_18], %22 {strides = array<i32>} : memref<8x1xf32, #tpu.memory_space<vmem>>, vector<8x1xf32>,
    %c0_i32_19 = arith.constant 0 : i32
    %35 = arith.cmpi eq, %arg1, %c0_i32_19 : i32
    %36 = arith.extui %35 : i1 to i32
    %c0_i32_20 = arith.constant 0 : i32
    %37 = arith.cmpi ne, %36, %c0_i32_20 : i32
    scf.if %37 {
      %c0_21 = arith.constant 0 : index
      %c0_22 = arith.constant 0 : index
      %38 = vector.load %arg5[%c0_21, %c0_22] : memref<8x1xf32, #tpu.memory_space<vmem>>, vector<8x1xf32>
      %c0_23 = arith.constant 0 : index
      %c0_24 = arith.constant 0 : index
      %39 = vector.load %arg6[%c0_23, %c0_24] : memref<8x1xf32, #tpu.memory_space<vmem>>, vector<8x1xf32>
      %40 = math.log %39 : vector<8x1xf32>
      %41 = arith.addf %38, %40 : vector<8x1xf32>
      %c0_25 = arith.constant 0 : index
      %c0_26 = arith.constant 0 : index
      %42 = vector.load %arg7[%c0_25, %c0_26] : memref<8x1xf32, #tpu.memory_space<vmem>>, vector<8x1xf32>
      %43 = arith.subf %41, %42 : vector<8x1xf32>
      %c0_27 = arith.constant 0 : index
      %c0_28 = arith.constant 0 : index
      %44 = vector.load %arg4[%c0_27, %c0_28] : memref<8x1xf32, #tpu.memory_space<vmem>>, vector<8x1xf32>
      tpu.vector_store %arg4[%c0_27, %c0_28], %43 {strides = array<i32>} : memref<8x1xf32, #tpu.memory_space<vmem>>, vector<8x1xf32>,
    } else {
    }
    return
  }
  func.func @transform_0(%arg0: i32, %arg1: i32) -> (i32, i32) {
    %c0_i32 = arith.constant 0 : i32
    return %arg0, %arg1 : i32, i32
  }
  func.func @transform_1(%arg0: i32, %arg1: i32) -> (i32, i32) {
    %c0_i32 = arith.constant 0 : i32
    %c0_i32_0 = arith.constant 0 : i32
    return %arg0, %c0_i32 : i32, i32
  }
  func.func @transform_2(%arg0: i32, %arg1: i32) -> (i32, i32) {
    %c0_i32 = arith.constant 0 : i32
    %c0_i32_0 = arith.constant 0 : i32
    return %arg0, %c0_i32 : i32, i32
  }
}

</mosaic_0001>

<bundles_post_ra>
// kernel: tpu_custom_call.1
= control target key start
LH: loop header
LB: loop body
LE: loop exit
PB: predicated region body
PF: predicated region fallthrough
CT: control target
= control target key end

     0   :  { %s405_s9 = smov 0   ;;  %s407_s10 = smov 0   ;;  %s456_s0 = inlined_call_operand.vmem [shape: f32[16,32], index: 0, kind: input, shape index: {}]   ;;  %s457_s1 = inlined_call_operand.vmem [shape: s32[16,1], index: 1, kind: input, shape index: {}]   ;;  %s458_s2 = inlined_call_operand.vmem [shape: f32[16,1], index: 2, kind: output, shape index: {}]  }
   0x1   :  { %s409_s11 = smov 0  }
   0x2 LB: > { %s24_s12 = sadd.s32 1, %s381_s10  ;;  %p322_p0 = scmp.ge.s32.totalorder %s385_s11, 1  ;;  %s385_s11 = sphi %s409_s11, %s12_s11   ;;  %s381_s10 = sphi %s407_s10, %s460_s10   ;;  %s377_s9 = sphi %s405_s9, %s459_s9  }
   0x3   : > { %p26_p1 = scmp.ge.s32.totalorder %s24_s12, 2  ;;  %p137_p2 = scmp.lt.s32.totalorder %s385_s11, 3 }
   0x5   : > { %s462_s12 = smov (%p26_p1, %s24_s12), 0  ;;  %p138_p3 = pnand %p322_p0, %p137_p2 }
   0x6   : > { %p164_p4 = scmp.lt.s32.totalorder (!%p138_p3), %s377_s9, 1 }
   0x7   : > { %141 = sbr.rel (%p138_p3) target bundleno = 402 (0x192), region = 28 }
   0xc   : > { %vm183_vm0 = vcmask 7168   ;;  %v387_v0 = vmov -inf   ;;  %s464_s9 = smov (!%p164_p4, %s377_s9), 1  ;;  %vm200_vm1 = vcmask 261120   ;;  %v388_v3 = vmov 0  }
   0xd   : > { %184 = vst.msk [vmem:[#allocation2] sm:$0xff] %vm183_vm0, %v387_v0  ;;  %s424_s13 = sshll.u32 %s464_s9, 3  ;;  %355 = vset.pattern.permute.xlu0 %v388_v3  ;;  %356 = vset.pattern.permute.xlu1 %v388_v3  ;;  %v389_v4 = vmov 0.0   ;;  %v192_v10 = vlaneseq }
   0xe   : > { %s170_s16 = scalar_lea.vmem %s456_s0, %s424_s13  ;;  %185 = vst.msk [vmem:[#allocation3] sm:$0xff] %vm183_vm0, %v389_v4  ;;  %s174_s19 = scalar_lea.vmem %s457_s1, %s424_s13 }
   0xf   : > { %v187_v1 = vld [vmem:[%s170_s16] sm:$0xff]  ;;  %186 = vst.msk [vmem:[#allocation4] sm:$0xff] %vm183_vm0, %v389_v4  ;;  %v193_v12 = vand.u32 127, %v192_v10  ;;  %s178_s22 = scalar_lea.vmem %s458_s2, %s424_s13 }
  0x10   : > { %v207_v2 = vsel %vm200_vm1, %v187_v1, -inf  ;;  %v188_v5 = vld [vmem:[%s174_s19] sm:$0xff] }
  0x11   : > { %208 = vmax.xlane.f32.xlu0 %v207_v2  ;;  %195 = vperm.xlu1 %356, %v188_v5  }
  0x14   : > { %v210_v6 = vld [vmem:[#allocation2] sm:$0xff] }
  0x15   : > { %v220_v25 = vld [vmem:[#allocation3] sm:$0xff] }
  0x16   : > { %v199_v20 = vld [vmem:[#allocation4] sm:$0xff] }
  0x83   : > { %v196_v11 = vpop.permute.xlu1 %195 }
  0x84   : > { %v209_v7 = vpop.xlane.xlu0 %208  ;;  %vm197_vm2 = vcmp.eq.s32.totalorder %v193_v12, %v196_v11 }
  0x85   : > { %v211_v8 = vmax.f32 %v210_v6, %v209_v7  ;;  %v198_v13 = vsel %vm197_vm2, %v187_v1, 0.0 }
  0x86   : > { %v201_v14 = vsel %vm200_vm1, %v198_v13, 0.0 }
  0x87   : > { %v221_v9 = vsub.f32 %v210_v6, %v211_v8  ;;  %230 = vst.msk [vmem:[#allocation2] sm:$0xff] %vm183_vm0, %v211_v8  ;;  %214 = vperm.xlu0 %355, %v211_v8   ;;  %202 = vadd.xlane.f32.xlu2 %v201_v14 }
  0x89   : > { %v222_v23 = vmul.f32 1.442695, %v221_v9 }
  0x8e   : > { %v234_v32 = vld [vmem:[#allocation2] sm:$0xff] }
  0xf9   : > { %v215_v15 = vpop.permute.xlu0 %214 }
  0xfa   : > { %v217_v16 = vsub.f32 %v187_v1, %v215_v15  ;;  %v203_v21 = vpop.xlane.xlu2 %202 }
  0xfb   : > { %v204_v22 = vadd.f32 %v203_v21, %v199_v20 }
  0xfc   : > { %v218_v17 = vmul.f32 1.442695, %v217_v16 }
  0xfd   : > { %206 = vst.msk [vmem:[#allocation4] sm:$0xff] %vm183_vm0, %v204_v22 }
  0xfe   : > { %357 = vpow2.f32 %v218_v17 }
  0xff   : > { %359 = vpow2.f32 %v222_v23 }
 0x104   : > { %v358_v18 = vpop.eup %357  ;;  %v239_v33 = vld [vmem:[#allocation4] sm:$0xff] }
 0x105   : > { %v225_v19 = vsel %vm200_vm1, %v358_v18, 0.0  ;;  %v360_v24 = vpop.eup %359 }
 0x106   : > { %226 = vadd.xlane.f32.xlu1 %v225_v19  ;;  %v224_v26 = vmul.f32 %v360_v24, %v220_v25 }
 0x179   : > { %v227_v27 = vpop.xlane.xlu1 %226 }
 0x17a   : > { %v228_v28 = vadd.f32 %v227_v27, %v224_v26 }
 0x17c   : > { %229 = vst.msk [vmem:[#allocation3] sm:$0xff] %vm183_vm0, %v228_v28 }
 0x183   : > { %v235_v29 = vld [vmem:[#allocation3] sm:$0xff] }
 0x184   : > { %361 = vlog2.f32 %v235_v29 }
 0x18a   : > { %v362_v30 = vpop.eup %361 }
 0x18b   : > { %v237_v31 = vmul.f32 0.6931472, %v362_v30 }
 0x18d   : > { %v238_v34 = vadd.f32 %v237_v31, %v234_v32 }
 0x18f   : > { %v240_v35 = vsub.f32 %v238_v34, %v239_v33 }
 0x191   : > { %241 = vst.msk [vmem:[%s178_s22] sm:$0xff] %vm183_vm0, %v240_v35 }
 0x192 PF: > { %s12_s11 = sadd.s32 1, %s385_s11   ;;  %s459_s9 = smov %s381_s10 }
 0x193   : > { %p9_p5 = scmp.ge.s32.totalorder %s12_s11, 4   ;;  %s460_s10 = smov %s462_s12 }
 0x195   :  { %11 = sbr.rel (!%p9_p5) target bundleno = 2 (0x2), region = 69 }

</bundles_post_ra>
